<compile_context>
chip_gen: v6e
topology: v6e:2x2x1
jax: 0.10.0
libtpu: 0.0.40
codegen_flags: <defaults>
</compile_context>

<pallas_src>
import functools

import jax
import jax.numpy as jnp
from jax.experimental import pallas as pl
from jax.experimental.pallas import tpu as pltpu


def _round_up(x, m):
    return ((x + m - 1) // m) * m


def _round_down(x, m):
    return (x // m) * m


def _pick_tile(batch, dim, itemsize):
    """Pick the row tile and a VMEM budget, per TPU generation."""
    try:
        vmem_bytes = int(pltpu.get_tpu_info().vmem_capacity_bytes)
    except Exception:
        vmem_bytes = 64 * 1024 * 1024  # conservative default (v7x per-TC VMEM)
    budget = (vmem_bytes * 3) // 4     # leave headroom for Mosaic internal scratch

    # VMEM footprint per row: 3 inputs x 2 pipeline buffers, lane-padded to 128,
    # plus the (negligible) double-buffered f32 output column.
    d_pad = _round_up(max(dim, 1), 128)
    per_row = 6 * d_pad * itemsize + 2 * 4

    tb = _round_down(budget // per_row, 8)
    tb = max(8, min(tb, 1024))            # ~86% of HBM roofline by tile 1024
    tb = min(tb, _round_up(batch, 8))     # never bigger than the (padded) batch
    return tb, budget


def _triplet_loss_kernel(a_ref, p_ref, n_ref, loss_ref, *, margin):
    # Elementwise stage in f32 (inputs here are f32; for bf16 inputs on
    # v6e/v7x the cast could be skipped — kernel is mem-bound either way).
    a = a_ref[...].astype(jnp.float32)
    p = p_ref[...].astype(jnp.float32)
    n = n_ref[...].astype(jnp.float32)

    # ap - an == sum((p - n) * (p + n - 2a), axis=1): one lane (XLU) reduction
    # instead of two, and fewer VPU ops than squaring both distances.
    diff = p - n
    ssum = (p - a) + (n - a)
    delta = jnp.sum(diff * ssum, axis=1, keepdims=True)      # (tb, 1)

    # Per-row hinge loss written directly; no cross-grid accumulator.
    loss_ref[...] = jnp.maximum(delta + jnp.float32(margin), 0.0)


def online_triplet_loss(anchor_embed, pos_embed, neg_embed, labels=None, *, margin=1.0):
    """Pallas implementation of OnlineTripletLoss.forward (num_triplets == 0 path).

    anchor_embed, pos_embed, neg_embed: [B, D] float arrays.
    labels: unused in this path (kept for signature parity).
    Returns a float32 scalar (mean hinge loss).
    """
    del labels  # unused in the fallback path
    B, D = anchor_embed.shape
    itemsize = jnp.dtype(anchor_embed.dtype).itemsize

    tb, vmem_budget = _pick_tile(B, D, itemsize)
    B_pad = _round_up(B, tb)
    if B_pad != B:
        pad = ((0, B_pad - B), (0, 0))
        anchor_embed = jnp.pad(anchor_embed, pad)
        pos_embed = jnp.pad(pos_embed, pad)
        neg_embed = jnp.pad(neg_embed, pad)

    grid = (B_pad // tb,)
    kernel = functools.partial(_triplet_loss_kernel, margin=float(margin))

    # NOTE: with small D (e.g. 32) only D/128 of each vreg's lanes are used,
    # but the kernel is HBM-bound and the DMA'd blocks span the full last dim
    # (contiguous in HBM), so lane under-utilization does not cost bandwidth.
    per_row = pl.pallas_call(
        kernel,
        out_shape=jax.ShapeDtypeStruct((B_pad, 1), jnp.float32),
        grid_spec=pltpu.PrefetchScalarGridSpec(
            num_scalar_prefetch=0,
            grid=grid,
            in_specs=[
                pl.BlockSpec((tb, D), lambda i: (i, 0)),
                pl.BlockSpec((tb, D), lambda i: (i, 0)),
                pl.BlockSpec((tb, D), lambda i: (i, 0)),
            ],
            out_specs=pl.BlockSpec((tb, 1), lambda i: (i, 0)),
        ),
        compiler_params=pltpu.CompilerParams(
            dimension_semantics=("parallel",),   # no cross-step dependency
            vmem_limit_bytes=int(vmem_budget),
        ),
    )(anchor_embed, pos_embed, neg_embed)

    # Final tiny reduction in plain JAX; divisor is the TRUE batch size, and
    # zero-padded rows (whose loss would be `margin`) are sliced away.
    return jnp.mean(per_row[:B, 0])


def _reference(anchor, pos, neg, margin):
    ap = jnp.sum((anchor - pos) ** 2, axis=1)
    an = jnp.sum((anchor - neg) ** 2, axis=1)
    return jnp.mean(jnp.maximum(ap - an + margin, 0.0))


if __name__ == "__main__":
    margin = 1.0
    key = jax.random.PRNGKey(0)

    # Case 1: batch divisible by 8.
    B, D = 64, 32
    k_a, k_p, k_n, k_l = jax.random.split(key, 4)
    anchor = jax.random.normal(k_a, (B, D), dtype=jnp.float32)
    pos = jax.random.normal(k_p, (B, D), dtype=jnp.float32)
    neg = jax.random.normal(k_n, (B, D), dtype=jnp.float32)
    labels = jax.random.randint(k_l, (B,), 0, 4, dtype=jnp.int32)

    loss = online_triplet_loss(anchor, pos, neg, labels, margin=margin)
    loss = jax.block_until_ready(loss)
    ref = _reference(anchor, pos, neg, margin)
    assert jnp.allclose(loss, ref, atol=1e-4, rtol=1e-4), (loss, ref)

    # Case 2: ragged batch (not a multiple of 8) exercises the padding path.
    B2 = 37
    loss2 = online_triplet_loss(anchor[:B2], pos[:B2], neg[:B2], labels[:B2], margin=margin)
    loss2 = jax.block_until_ready(loss2)
    ref2 = _reference(anchor[:B2], pos[:B2], neg[:B2], margin)
    assert jnp.allclose(loss2, ref2, atol=1e-4, rtol=1e-4), (loss2, ref2)

    print("KERNEL_OK")
</pallas_src>

<mosaic_0001>
module attributes {stable_mosaic.version = 11 : i64} {
  func.func @_triplet_loss_kernel(%arg0: i32, %arg1: memref<64x32xf32, #tpu.memory_space<vmem>>, %arg2: memref<64x32xf32, #tpu.memory_space<vmem>>, %arg3: memref<64x32xf32, #tpu.memory_space<vmem>>, %arg4: memref<64x1xf32, #tpu.memory_space<vmem>>) attributes {dimension_semantics = [#tpu.dimension_semantics<parallel>], iteration_bounds = array<i64: 1>, scalar_prefetch = 0 : i64, scratch_operands = 0 : i64, tpu.core_type = #tpu.core_type<tc>, window_params = [{transform_indices = @transform_0, window_bounds = array<i64: 64, 32>}, {transform_indices = @transform_1, window_bounds = array<i64: 64, 32>}, {transform_indices = @transform_2, window_bounds = array<i64: 64, 32>}, {transform_indices = @transform_3, window_bounds = array<i64: 64, 1>}]} {
    %c0 = arith.constant 0 : index
    %c0_0 = arith.constant 0 : index
    %0 = vector.load %arg1[%c0, %c0_0] : memref<64x32xf32, #tpu.memory_space<vmem>>, vector<64x32xf32>
    %c0_1 = arith.constant 0 : index
    %c0_2 = arith.constant 0 : index
    %1 = vector.load %arg2[%c0_1, %c0_2] : memref<64x32xf32, #tpu.memory_space<vmem>>, vector<64x32xf32>
    %c0_3 = arith.constant 0 : index
    %c0_4 = arith.constant 0 : index
    %2 = vector.load %arg3[%c0_3, %c0_4] : memref<64x32xf32, #tpu.memory_space<vmem>>, vector<64x32xf32>
    %3 = arith.subf %1, %2 : vector<64x32xf32>
    %4 = arith.subf %1, %0 : vector<64x32xf32>
    %5 = arith.subf %2, %0 : vector<64x32xf32>
    %6 = arith.addf %4, %5 : vector<64x32xf32>
    %7 = arith.mulf %3, %6 : vector<64x32xf32>
    %cst = arith.constant dense<0.000000e+00> : vector<64xf32>
    %8 = vector.multi_reduction <add>, %7, %cst [1] : vector<64x32xf32> to vector<64xf32>
    %9 = vector.shape_cast %8 : vector<64xf32> to vector<64x1xf32>
    %cst_5 = arith.constant 1.000000e+00 : f32
    %10 = vector.broadcast %cst_5 : f32 to vector<64x1xf32>
    %11 = arith.addf %9, %10 : vector<64x1xf32>
    %cst_6 = arith.constant 0.000000e+00 : f32
    %12 = vector.broadcast %cst_6 : f32 to vector<64x1xf32>
    %13 = arith.maximumf %11, %12 : vector<64x1xf32>
    %c0_7 = arith.constant 0 : index
    %c0_8 = arith.constant 0 : index
    %14 = vector.load %arg4[%c0_7, %c0_8] : memref<64x1xf32, #tpu.memory_space<vmem>>, vector<64x1xf32>
    tpu.vector_store %arg4[%c0_7, %c0_8], %13 {strides = array<i32>} : memref<64x1xf32, #tpu.memory_space<vmem>>, vector<64x1xf32>,
    return
  }
  func.func @transform_0(%arg0: i32) -> (i32, i32) {
    %c0_i32 = arith.constant 0 : i32
    %c0_i32_0 = arith.constant 0 : i32
    return %arg0, %c0_i32 : i32, i32
  }
  func.func @transform_1(%arg0: i32) -> (i32, i32) {
    %c0_i32 = arith.constant 0 : i32
    %c0_i32_0 = arith.constant 0 : i32
    return %arg0, %c0_i32 : i32, i32
  }
  func.func @transform_2(%arg0: i32) -> (i32, i32) {
    %c0_i32 = arith.constant 0 : i32
    %c0_i32_0 = arith.constant 0 : i32
    return %arg0, %c0_i32 : i32, i32
  }
  func.func @transform_3(%arg0: i32) -> (i32, i32) {
    %c0_i32 = arith.constant 0 : i32
    %c0_i32_0 = arith.constant 0 : i32
    return %arg0, %c0_i32 : i32, i32
  }
}

</mosaic_0001>

<bundles_post_ra>
// kernel: tpu_custom_call.1
= control target key start
LH: loop header
LB: loop body
LE: loop exit
PB: predicated region body
PF: predicated region fallthrough
CT: control target
= control target key end

     0   :  { %vm78_vm0 = vcmask 261120   ;;  %vm119_vm1 = vcmask 7168   ;;  %s264_s0 = inlined_call_operand.vmem [shape: f32[64,32], index: 0, kind: input, shape index: {}]   ;;  %s265_s1 = inlined_call_operand.vmem [shape: f32[64,32], index: 1, kind: input, shape index: {}]   ;;  %s266_s2 = inlined_call_operand.vmem [shape: f32[64,32], index: 2, kind: input, shape index: {}]   ;;  %s267_s3 = inlined_call_operand.vmem [shape: f32[64,1], index: 3, kind: output, shape index: {}]  }
   0x1   :  { %v16_v0 = vld [vmem:[%s264_s0 + $0x10] sm:$0xff]  ;;  %v14_v6 = vld [vmem:[%s264_s0] sm:$0xff]  ;;  %v17_v12 = vld [vmem:[%s264_s0 + $0x18] sm:$0xff] }
   0x2   :  { %v24_v1 = vld [vmem:[%s265_s1 + $0x10] sm:$0xff]  ;;  %v22_v7 = vld [vmem:[%s265_s1] sm:$0xff]  ;;  %v25_v13 = vld [vmem:[%s265_s1 + $0x18] sm:$0xff] }
   0x3   :  { %v32_v2 = vld [vmem:[%s266_s2 + $0x10] sm:$0xff]  ;;  %v48_v4 = vsub.f32 %v24_v1, %v16_v0  ;;  %v30_v8 = vld [vmem:[%s266_s2] sm:$0xff]  ;;  %v46_v10 = vsub.f32 %v22_v7, %v14_v6  ;;  %v33_v14 = vld [vmem:[%s266_s2 + $0x18] sm:$0xff]  ;;  %v49_v17 = vsub.f32 %v25_v13, %v17_v12 }
   0x4   :  { %v40_v3 = vsub.f32 %v24_v1, %v32_v2  ;;  %v56_v5 = vsub.f32 %v32_v2, %v16_v0  ;;  %v38_v9 = vsub.f32 %v22_v7, %v30_v8  ;;  %v54_v11 = vsub.f32 %v30_v8, %v14_v6  ;;  %v15_v19 = vld [vmem:[%s264_s0 + $0x8] sm:$0xff]  ;;  %v18_v33 = vld [vmem:[%s264_s0 + $0x20] sm:$0xff]  ;;  %v21_v40 = vld [vmem:[%s264_s0 + $0x38] sm:$0xff] }
   0x5   :  { %v41_v16 = vsub.f32 %v25_v13, %v33_v14  ;;  %v57_v18 = vsub.f32 %v33_v14, %v17_v12  ;;  %v23_v20 = vld [vmem:[%s265_s1 + $0x8] sm:$0xff]  ;;  %v26_v34 = vld [vmem:[%s265_s1 + $0x20] sm:$0xff]  ;;  %v29_v41 = vld [vmem:[%s265_s1 + $0x38] sm:$0xff] }
   0x6   :  { %v64_v15 = vadd.f32 %v56_v5, %v48_v4  ;;  %v31_v21 = vld [vmem:[%s266_s2 + $0x8] sm:$0xff]  ;;  %v62_v22 = vadd.f32 %v54_v11, %v46_v10  ;;  %v47_v24 = vsub.f32 %v23_v20, %v15_v19  ;;  %v34_v35 = vld [vmem:[%s266_s2 + $0x20] sm:$0xff]  ;;  %v37_v42 = vld [vmem:[%s266_s2 + $0x38] sm:$0xff]  ;;  %v50_v45 = vsub.f32 %v26_v34, %v18_v33 }
   0x7   :  { %v39_v23 = vsub.f32 %v23_v20, %v31_v21  ;;  %v55_v25 = vsub.f32 %v31_v21, %v15_v19  ;;  %v19_v26 = vld [vmem:[%s264_s0 + $0x28] sm:$0xff]  ;;  %v65_v30 = vadd.f32 %v57_v18, %v49_v17  ;;  %v42_v39 = vsub.f32 %v26_v34, %v34_v35  ;;  %v20_v47 = vld [vmem:[%s264_s0 + $0x30] sm:$0xff] }
   0x8   :  { %v27_v27 = vld [vmem:[%s265_s1 + $0x28] sm:$0xff]  ;;  %v72_v29 = vmul.f32 %v64_v15, %v40_v3  ;;  %v70_v36 = vmul.f32 %v62_v22, %v38_v9  ;;  %v58_v46 = vsub.f32 %v34_v35, %v18_v33  ;;  %v28_v48 = vld [vmem:[%s265_s1 + $0x30] sm:$0xff]  ;;  %v45_v52 = vsub.f32 %v29_v41, %v37_v42 }
   0x9   :  { %v35_v28 = vld [vmem:[%s266_s2 + $0x28] sm:$0xff]  ;;  %v51_v32 = vsub.f32 %v27_v27, %v19_v26  ;;  %v63_v37 = vadd.f32 %v55_v25, %v47_v24  ;;  %v73_v44 = vmul.f32 %v65_v30, %v41_v16  ;;  %v36_v53 = vld [vmem:[%s266_s2 + $0x30] sm:$0xff]  ;;  %v53_v56 = vsub.f32 %v29_v41, %v21_v40 }
   0xa   :  { %v43_v31 = vsub.f32 %v27_v27, %v35_v28  ;;  %v59_v38 = vsub.f32 %v35_v28, %v19_v26  ;;  %v85_v43 = vsel %vm78_vm0, %v72_v29, 0.0  ;;  %v79_v49 = vsel %vm78_vm0, %v70_v36, 0.0 }
   0xb   :  { %86 = vadd.xlane.f32.xlu1 %v85_v43  ;;  %v71_v50 = vmul.f32 %v63_v37, %v39_v23  ;;  %80 = vadd.xlane.f32.xlu0 %v79_v49  ;;  %v88_v54 = vsel %vm78_vm0, %v73_v44, 0.0  ;;  %v66_v55 = vadd.f32 %v58_v46, %v50_v45  ;;  %v61_v57 = vsub.f32 %v37_v42, %v21_v40 }
   0xc   :  { %v67_v51 = vadd.f32 %v59_v38, %v51_v32  ;;  %v52_v60 = vsub.f32 %v28_v48, %v20_v47  ;;  %v44_v63 = vsub.f32 %v28_v48, %v36_v53  ;;  %v60_v0 = vsub.f32 %v36_v53, %v20_v47 }
   0xd   :  { %v82_v58 = vsel %vm78_vm0, %v71_v50, 0.0  ;;  %v74_v61 = vmul.f32 %v66_v55, %v42_v39  ;;  %v69_v62 = vadd.f32 %v61_v57, %v53_v56 }
   0xe   :  { %v75_v59 = vmul.f32 %v67_v51, %v43_v31  ;;  %v68_v3 = vadd.f32 %v60_v0, %v52_v60 }
   0xf   :  { %89 = vadd.xlane.f32.xlu1 %v88_v54  ;;  %83 = vadd.xlane.f32.xlu0 %v82_v58  ;;  %v77_v2 = vmul.f32 %v69_v62, %v45_v52  ;;  %v91_v4 = vsel %vm78_vm0, %v74_v61, 0.0 }
  0x10   :  { %v94_v1 = vsel %vm78_vm0, %v75_v59, 0.0  ;;  %v76_v5 = vmul.f32 %v68_v3, %v44_v63 }
  0x11   :  { %v100_v6 = vsel %vm78_vm0, %v77_v2, 0.0 }
  0x12   :  { %v97_v7 = vsel %vm78_vm0, %v76_v5, 0.0 }
  0x13   :  { %95 = vadd.xlane.f32.xlu1 %v94_v1  ;;  %92 = vadd.xlane.f32.xlu0 %v91_v4 }
  0x17   :  { %101 = vadd.xlane.f32.xlu1 %v100_v6  ;;  %98 = vadd.xlane.f32.xlu0 %v97_v7 }
  0x94   :  { %v87_v8 = vpop.xlane.xlu1 %86  ;;  %v81_v10 = vpop.xlane.xlu0 %80 }
  0x95   :  { %v105_v9 = vadd.f32 1.0, %v87_v8  ;;  %v103_v11 = vadd.f32 1.0, %v81_v10 }
  0x97   :  { %v113_v12 = vmax.f32 %v105_v9, 0.0  ;;  %v111_v13 = vmax.f32 %v103_v11, 0.0 }
  0x98   :  { %v90_v14 = vpop.xlane.xlu1 %89  ;;  %v84_v16 = vpop.xlane.xlu0 %83 }
  0x99   :  { %122 = vst.msk [vmem:[%s267_s3 + $0x10] sm:$0xff] %vm119_vm1, %v113_v12  ;;  %v106_v15 = vadd.f32 1.0, %v90_v14  ;;  %120 = vst.msk [vmem:[%s267_s3] sm:$0xff] %vm119_vm1, %v111_v13  ;;  %v104_v17 = vadd.f32 1.0, %v84_v16 }
  0x9b   :  { %v114_v18 = vmax.f32 %v106_v15, 0.0  ;;  %v112_v19 = vmax.f32 %v104_v17, 0.0 }
  0x9c   :  { %v96_v20 = vpop.xlane.xlu1 %95  ;;  %v93_v22 = vpop.xlane.xlu0 %92 }
  0x9d   :  { %123 = vst.msk [vmem:[%s267_s3 + $0x18] sm:$0xff] %vm119_vm1, %v114_v18  ;;  %v108_v21 = vadd.f32 1.0, %v96_v20  ;;  %121 = vst.msk [vmem:[%s267_s3 + $0x8] sm:$0xff] %vm119_vm1, %v112_v19  ;;  %v107_v23 = vadd.f32 1.0, %v93_v22 }
  0x9f   :  { %v116_v24 = vmax.f32 %v108_v21, 0.0  ;;  %v115_v25 = vmax.f32 %v107_v23, 0.0 }
  0xa0   :  { %v102_v26 = vpop.xlane.xlu1 %101  ;;  %v99_v28 = vpop.xlane.xlu0 %98 }
  0xa1   :  { %125 = vst.msk [vmem:[%s267_s3 + $0x28] sm:$0xff] %vm119_vm1, %v116_v24  ;;  %v110_v27 = vadd.f32 1.0, %v102_v26  ;;  %124 = vst.msk [vmem:[%s267_s3 + $0x20] sm:$0xff] %vm119_vm1, %v115_v25  ;;  %v109_v29 = vadd.f32 1.0, %v99_v28 }
  0xa3   :  { %v118_v30 = vmax.f32 %v110_v27, 0.0  ;;  %v117_v31 = vmax.f32 %v109_v29, 0.0 }
  0xa5   :  { %127 = vst.msk [vmem:[%s267_s3 + $0x38] sm:$0xff] %vm119_vm1, %v118_v30  ;;  %126 = vst.msk [vmem:[%s267_s3 + $0x30] sm:$0xff] %vm119_vm1, %v117_v31 }

</bundles_post_ra>
